<compile_context>
chip_gen: v7x
topology: tpu7x:2x2x1
jax: 0.10.0
libtpu: 0.0.40
codegen_flags: <defaults>
</compile_context>

<pallas_src>
import functools

import jax
import jax.numpy as jnp
from jax.experimental import pallas as pl
from jax.experimental.pallas import tpu as pltpu


def _contextual_kernel(x_ref, y_ref, mu_row_ref, mu_col_ref, out_ref, yn_ref,
                       *, band_width):
    """One (batch, x-pixel-tile) step of the contextual-similarity computation.

    x_ref      : (1, TP, C)  tile of x pixels (pixels on sublanes, channels on lanes)
    y_ref      : (1, C, HW)  full y feature map for this batch (pixels on lanes)
    mu_row_ref : (1, C)      channel-wise mean of y (broadcast layout for x)
    mu_col_ref : (C, 1)      channel-wise mean of y (broadcast layout for y)
    out_ref    : (1, 1, HW)  running max_p cx[p, q]  (resident across p tiles)
    yn_ref     : (C, HW)     VMEM scratch holding normalized y (per batch)
    """
    p_id = pl.program_id(1)

    # --- once per batch: center + L2-normalize y into persistent VMEM scratch ---
    @pl.when(p_id == 0)
    def _():
        yc = y_ref[0] - mu_col_ref[...]                            # (C, HW)
        ss = jnp.sum(yc * yc, axis=0, keepdims=True)               # (1, HW)
        # F.normalize(eps=1e-12): x / max(||x||, eps) == x * rsqrt(max(ss, eps^2))
        yn_ref[...] = yc * jax.lax.rsqrt(jnp.maximum(ss, 1e-24))

    # --- per tile: center + L2-normalize the x tile (tiny: TP x C) ---
    xc = x_ref[0] - mu_row_ref[...]                                # (TP, C)
    xss = jnp.sum(xc * xc, axis=-1, keepdims=True)                 # (TP, 1)
    xn = xc * jax.lax.rsqrt(jnp.maximum(xss, 1e-24))               # (TP, C)

    # cosine similarity slab on the MXU: (TP, C) x (C, HW) -> (TP, HW)
    sim = jax.lax.dot_general(
        xn, yn_ref[...],
        dimension_numbers=(((1,), (0,)), ((), ())),
        preferred_element_type=jnp.float32)

    # dist = 1 - sim;  dmin = min_q dist = 1 - max_q sim   (per x-pixel row)
    smax = jnp.max(sim, axis=-1, keepdims=True)                    # (TP, 1)
    # Shift-invariant softmax: exp((1 - d~)/h) / sum == exp(-d~/h) / sum, so the
    # per-row constant exp(1/h) is dropped. Per-row reciprocals instead of
    # HW^2 divides.
    r_neg = -pl.reciprocal(band_width * ((1.0 - smax) + 1e-5))     # (TP, 1)
    w = jnp.exp((1.0 - sim) * r_neg)                               # (TP, HW)
    inv_l = pl.reciprocal(jnp.sum(w, axis=-1, keepdims=True))      # (TP, 1)
    tile_max = jnp.max(w * inv_l, axis=0, keepdims=True)           # (1, HW)

    # --- max-accumulate over x-pixel tiles into the resident output block ---
    @pl.when(p_id == 0)
    def _():
        out_ref[0] = tile_max

    @pl.when(p_id > 0)
    def _():
        out_ref[0] = jnp.maximum(out_ref[0], tile_max)


def _pick_tp(hw, c, vmem_budget_bytes=40 * 1024 * 1024):
    """Largest x-pixel tile (multiple of 128, divisor of HW) fitting the budget."""
    for t in (2048, 1024, 512, 256, 128):
        if t <= hw and hw % t == 0:
            est = 4 * (4 * t * hw + 12 * hw * max(c, 8))
            if est < vmem_budget_bytes:
                return t
    return hw  # fall back to a single tile (small / oddly-sized inputs)


def contextual_loss_pallas(x, y, band_width: float = 0.5, tp: int = None):
    """x, y: NCHW float arrays of identical shape. Returns scalar loss."""
    assert x.shape == y.shape, "input tensor must have the same size."
    n, c, h, w = x.shape
    hw = h * w

    x = x.astype(jnp.float32)
    y = y.astype(jnp.float32)

    # --- tiny plain-JAX glue ---
    y_mu = jnp.mean(y, axis=(0, 2, 3))                 # (C,) global channel mean
    mu_row = y_mu.reshape(1, c)                        # broadcast layout for x tiles
    mu_col = y_mu.reshape(c, 1)                        # broadcast layout for y
    xf = jnp.transpose(x, (0, 2, 3, 1)).reshape(n, hw, c)   # (N, HW, C)
    yf = y.reshape(n, c, hw)                                 # (N, C, HW) -- free reshape

    if tp is None:
        tp = _pick_tp(hw, c)
    assert hw % tp == 0, f"tile {tp} must divide HW={hw}"
    num_p = hw // tp

    # Explicit VMEM budget: ~4 live (TP, HW) f32 slabs + y / yn / x-tile /
    # output buffers (sublane / lane padded), plus margin.
    est = 4 * (4 * tp * hw + 3 * 8 * hw + 2 * tp * 128 + 2 * 8 * hw)
    vmem_limit = int(min(max(est + (4 << 20), 16 << 20), 100 << 20))

    cost = pl.CostEstimate(
        flops=int(2 * n * hw * hw * c + 6 * n * hw * hw),
        transcendentals=int(n * hw * hw),
        bytes_accessed=int(4 * (2 * n * hw * c + n * hw)),
    )

    kernel = functools.partial(_contextual_kernel, band_width=float(band_width))

    cx_max = pl.pallas_call(
        kernel,
        out_shape=jax.ShapeDtypeStruct((n, 1, hw), jnp.float32),
        grid_spec=pltpu.PrefetchScalarGridSpec(
            num_scalar_prefetch=0,
            grid=(n, num_p),
            in_specs=[
                pl.BlockSpec((1, tp, c), lambda i, p: (i, p, 0)),   # x tile
                pl.BlockSpec((1, c, hw), lambda i, p: (i, 0, 0)),   # y (resident per batch)
                pl.BlockSpec((1, c), lambda i, p: (0, 0)),          # mu (row layout)
                pl.BlockSpec((c, 1), lambda i, p: (0, 0)),          # mu (col layout)
            ],
            out_specs=pl.BlockSpec((1, 1, hw), lambda i, p: (i, 0, 0)),
            scratch_shapes=[pltpu.VMEM((c, hw), jnp.float32)],      # normalized y
        ),
        compiler_params=pltpu.CompilerParams(
            dimension_semantics=("parallel", "arbitrary"),
            vmem_limit_bytes=vmem_limit,
        ),
        cost_estimate=cost,
    )(xf, yf, mu_row, mu_col)

    # glue: mean over y-pixels per batch, then -log and batch mean
    cx = jnp.mean(cx_max[:, 0, :], axis=-1)            # (N,)
    return jnp.mean(-jnp.log(cx + 1e-5))


def contextual_loss_ref(x, y, band_width: float = 0.5):
    """Pure-JAX reference mirroring the PyTorch code (cosine loss_type)."""
    x = x.astype(jnp.float32)
    y = y.astype(jnp.float32)
    n, c, h, w = x.shape
    y_mu = jnp.mean(y, axis=(0, 2, 3), keepdims=True)
    xc = x - y_mu
    yc = y - y_mu
    xn = xc / jnp.maximum(jnp.sqrt(jnp.sum(xc * xc, axis=1, keepdims=True)), 1e-12)
    yn = yc / jnp.maximum(jnp.sqrt(jnp.sum(yc * yc, axis=1, keepdims=True)), 1e-12)
    xv = xn.reshape(n, c, -1)
    yv = yn.reshape(n, c, -1)
    sim = jnp.einsum("ncp,ncq->npq", xv, yv)
    dist = 1.0 - sim
    dmin = jnp.min(dist, axis=2, keepdims=True)
    dt = dist / (dmin + 1e-5)
    wgt = jnp.exp((1.0 - dt) / band_width)
    cx = wgt / jnp.sum(wgt, axis=2, keepdims=True)
    cx = jnp.mean(jnp.max(cx, axis=1), axis=1)
    return jnp.mean(-jnp.log(cx + 1e-5))


if __name__ == "__main__":
    key = jax.random.PRNGKey(0)
    kx, ky = jax.random.split(key)
    N, C, H, W = 2, 4, 16, 16
    x = jax.random.normal(kx, (N, C, H, W), dtype=jnp.float32)
    y = jax.random.normal(ky, (N, C, H, W), dtype=jnp.float32)

    ref = jax.block_until_ready(contextual_loss_ref(x, y, band_width=0.5))

    # exercise the tiled / max-accumulating path (HW=256, TP=128 -> 2 p-tiles)
    loss = jax.block_until_ready(contextual_loss_pallas(x, y, band_width=0.5, tp=128))
    assert jnp.isfinite(loss), "loss is not finite"
    assert jnp.allclose(loss, ref, rtol=1e-4, atol=1e-5), (loss, ref)

    # auto-picked tile size (single tile at this small size)
    loss2 = jax.block_until_ready(contextual_loss_pallas(x, y, band_width=0.5))
    assert jnp.allclose(loss2, ref, rtol=1e-4, atol=1e-5), (loss2, ref)

    print("KERNEL_OK")
</pallas_src>

<mosaic_0001>
module attributes {stable_mosaic.version = 11 : i64} {
  func.func @_contextual_kernel(%arg0: i32, %arg1: i32, %arg2: memref<1x128x4xf32, #tpu.memory_space<vmem>>, %arg3: memref<1x4x256xf32, #tpu.memory_space<vmem>>, %arg4: memref<1x4xf32, #tpu.memory_space<vmem>>, %arg5: memref<4x1xf32, #tpu.memory_space<vmem>>, %arg6: memref<1x1x256xf32, #tpu.memory_space<vmem>>, %arg7: memref<4x256xf32, #tpu.memory_space<vmem>>) attributes {dimension_semantics = [#tpu.dimension_semantics<parallel>, #tpu.dimension_semantics<arbitrary>], iteration_bounds = array<i64: 2, 2>, scalar_prefetch = 0 : i64, scratch_operands = 1 : i64, tpu.core_type = #tpu.core_type<tc>, window_params = [{transform_indices = @transform_0, window_bounds = array<i64: 1, 128, 4>}, {transform_indices = @transform_1, window_bounds = array<i64: 1, 4, 256>}, {pipeline_mode = #tpu.pipeline_mode<synchronous>, transform_indices = @transform_2, window_bounds = array<i64: 1, 4>}, {pipeline_mode = #tpu.pipeline_mode<synchronous>, transform_indices = @transform_3, window_bounds = array<i64: 4, 1>}, {transform_indices = @transform_4, window_bounds = array<i64: 1, 1, 256>}]} {
    %c0_i32 = arith.constant 0 : i32
    %0 = arith.cmpi eq, %arg1, %c0_i32 : i32
    %1 = arith.extui %0 : i1 to i32
    %c0_i32_0 = arith.constant 0 : i32
    %2 = arith.cmpi ne, %1, %c0_i32_0 : i32
    scf.if %2 {
      %c0_21 = arith.constant 0 : index
      %c0_22 = arith.constant 0 : index
      %c0_23 = arith.constant 0 : index
      %47 = vector.load %arg3[%c0_21, %c0_22, %c0_23] : memref<1x4x256xf32, #tpu.memory_space<vmem>>, vector<1x4x256xf32>
      %48 = vector.shape_cast %47 : vector<1x4x256xf32> to vector<4x256xf32>
      %c0_24 = arith.constant 0 : index
      %c0_25 = arith.constant 0 : index
      %49 = vector.load %arg5[%c0_24, %c0_25] : memref<4x1xf32, #tpu.memory_space<vmem>>, vector<4x1xf32>
      %50 = vector.broadcast %49 : vector<4x1xf32> to vector<4x256xf32>
      %51 = arith.subf %48, %50 : vector<4x256xf32>
      %52 = arith.mulf %51, %51 : vector<4x256xf32>
      %cst_26 = arith.constant dense<0.000000e+00> : vector<256xf32>
      %53 = vector.multi_reduction <add>, %52, %cst_26 [0] : vector<4x256xf32> to vector<256xf32>
      %54 = vector.shape_cast %53 : vector<256xf32> to vector<1x256xf32>
      %cst_27 = arith.constant 1.000000e-24 : f32
      %55 = vector.broadcast %cst_27 : f32 to vector<1x256xf32>
      %56 = arith.maximumf %54, %55 : vector<1x256xf32>
      %57 = math.rsqrt %56 : vector<1x256xf32>
      %58 = vector.broadcast %57 : vector<1x256xf32> to vector<4x256xf32>
      %59 = arith.mulf %51, %58 : vector<4x256xf32>
      %c0_28 = arith.constant 0 : index
      %c0_29 = arith.constant 0 : index
      %60 = vector.load %arg7[%c0_28, %c0_29] : memref<4x256xf32, #tpu.memory_space<vmem>>, vector<4x256xf32>
      tpu.vector_store %arg7[%c0_28, %c0_29], %59 {strides = array<i32>} : memref<4x256xf32, #tpu.memory_space<vmem>>, vector<4x256xf32>,
    } else {
    }
    %c0 = arith.constant 0 : index
    %c0_1 = arith.constant 0 : index
    %c0_2 = arith.constant 0 : index
    %3 = vector.load %arg2[%c0, %c0_1, %c0_2] : memref<1x128x4xf32, #tpu.memory_space<vmem>>, vector<1x128x4xf32>
    %4 = vector.shape_cast %3 : vector<1x128x4xf32> to vector<128x4xf32>
    %c0_3 = arith.constant 0 : index
    %c0_4 = arith.constant 0 : index
    %5 = vector.load %arg4[%c0_3, %c0_4] : memref<1x4xf32, #tpu.memory_space<vmem>>, vector<1x4xf32>
    %6 = vector.broadcast %5 : vector<1x4xf32> to vector<128x4xf32>
    %7 = arith.subf %4, %6 : vector<128x4xf32>
    %8 = arith.mulf %7, %7 : vector<128x4xf32>
    %cst = arith.constant dense<0.000000e+00> : vector<128xf32>
    %9 = vector.multi_reduction <add>, %8, %cst [1] : vector<128x4xf32> to vector<128xf32>
    %10 = vector.shape_cast %9 : vector<128xf32> to vector<128x1xf32>
    %cst_5 = arith.constant 1.000000e-24 : f32
    %11 = vector.broadcast %cst_5 : f32 to vector<128x1xf32>
    %12 = arith.maximumf %10, %11 : vector<128x1xf32>
    %13 = math.rsqrt %12 : vector<128x1xf32>
    %14 = vector.broadcast %13 : vector<128x1xf32> to vector<128x4xf32>
    %15 = arith.mulf %7, %14 : vector<128x4xf32>
    %c0_6 = arith.constant 0 : index
    %c0_7 = arith.constant 0 : index
    %16 = vector.load %arg7[%c0_6, %c0_7] : memref<4x256xf32, #tpu.memory_space<vmem>>, vector<4x256xf32>
    %cst_8 = arith.constant dense<0.000000e+00> : vector<128x256xf32>
    %17 = tpu.matmul %15, %16, %cst_8 {dimension_numbers = #tpu.dot_dimension_numbers<[1], [0], [0], [1], [0, 0, 1, 1], [], []>} : vector<128x4xf32>, vector<4x256xf32>, vector<128x256xf32> -> vector<128x256xf32>
    %cst_9 = arith.constant dense<0xFF800000> : vector<128xf32>
    %18 = vector.multi_reduction <maximumf>, %17, %cst_9 [1] : vector<128x256xf32> to vector<128xf32>
    %19 = vector.shape_cast %18 : vector<128xf32> to vector<128x1xf32>
    %cst_10 = arith.constant 1.000000e+00 : f32
    %20 = vector.broadcast %cst_10 : f32 to vector<128x1xf32>
    %21 = arith.subf %20, %19 : vector<128x1xf32>
    %cst_11 = arith.constant 9.99999974E-6 : f32
    %22 = vector.broadcast %cst_11 : f32 to vector<128x1xf32>
    %23 = arith.addf %21, %22 : vector<128x1xf32>
    %cst_12 = arith.constant 5.000000e-01 : f32
    %24 = vector.broadcast %cst_12 : f32 to vector<128x1xf32>
    %25 = arith.mulf %24, %23 : vector<128x1xf32>
    %26 = tpu.reciprocal %25 : vector<128x1xf32> -> vector<128x1xf32>
    %cst_13 = arith.constant 0.000000e+00 : f32
    %27 = vector.broadcast %cst_13 : f32 to vector<128x1xf32>
    %28 = arith.subf %27, %26 : vector<128x1xf32>
    %cst_14 = arith.constant 1.000000e+00 : f32
    %29 = vector.broadcast %cst_14 : f32 to vector<128x256xf32>
    %30 = arith.subf %29, %17 : vector<128x256xf32>
    %31 = vector.broadcast %28 : vector<128x1xf32> to vector<128x256xf32>
    %32 = arith.mulf %30, %31 : vector<128x256xf32>
    %33 = math.exp %32 : vector<128x256xf32>
    %cst_15 = arith.constant dense<0.000000e+00> : vector<128xf32>
    %34 = vector.multi_reduction <add>, %33, %cst_15 [1] : vector<128x256xf32> to vector<128xf32>
    %35 = vector.shape_cast %34 : vector<128xf32> to vector<128x1xf32>
    %36 = tpu.reciprocal %35 : vector<128x1xf32> -> vector<128x1xf32>
    %37 = vector.broadcast %36 : vector<128x1xf32> to vector<128x256xf32>
    %38 = arith.mulf %33, %37 : vector<128x256xf32>
    %cst_16 = arith.constant dense<0xFF800000> : vector<256xf32>
    %39 = vector.multi_reduction <maximumf>, %38, %cst_16 [0] : vector<128x256xf32> to vector<256xf32>
    %40 = vector.shape_cast %39 : vector<256xf32> to vector<1x256xf32>
    %c0_i32_17 = arith.constant 0 : i32
    %41 = arith.cmpi eq, %arg1, %c0_i32_17 : i32
    %42 = arith.extui %41 : i1 to i32
    %c0_i32_18 = arith.constant 0 : i32
    %43 = arith.cmpi ne, %42, %c0_i32_18 : i32
    scf.if %43 {
      %c0_21 = arith.constant 0 : index
      %c0_22 = arith.constant 0 : index
      %c0_23 = arith.constant 0 : index
      %47 = vector.load %arg6[%c0_21, %c0_22, %c0_23] : memref<1x1x256xf32, #tpu.memory_space<vmem>>, vector<1x1x256xf32>
      %48 = vector.shape_cast %47 : vector<1x1x256xf32> to vector<1x256xf32>
      %49 = vector.shape_cast %40 : vector<1x256xf32> to vector<1x1x256xf32>
      tpu.vector_store %arg6[%c0_21, %c0_22, %c0_23], %49 {strides = array<i32>} : memref<1x1x256xf32, #tpu.memory_space<vmem>>, vector<1x1x256xf32>,
    } else {
    }
    %c0_i32_19 = arith.constant 0 : i32
    %44 = arith.cmpi sgt, %arg1, %c0_i32_19 : i32
    %45 = arith.extui %44 : i1 to i32
    %c0_i32_20 = arith.constant 0 : i32
    %46 = arith.cmpi ne, %45, %c0_i32_20 : i32
    scf.if %46 {
      %c0_21 = arith.constant 0 : index
      %c0_22 = arith.constant 0 : index
      %c0_23 = arith.constant 0 : index
      %47 = vector.load %arg6[%c0_21, %c0_22, %c0_23] : memref<1x1x256xf32, #tpu.memory_space<vmem>>, vector<1x1x256xf32>
      %48 = vector.shape_cast %47 : vector<1x1x256xf32> to vector<1x256xf32>
      %49 = arith.maximumf %48, %40 : vector<1x256xf32>
      %c0_24 = arith.constant 0 : index
      %c0_25 = arith.constant 0 : index
      %c0_26 = arith.constant 0 : index
      %50 = vector.load %arg6[%c0_24, %c0_25, %c0_26] : memref<1x1x256xf32, #tpu.memory_space<vmem>>, vector<1x1x256xf32>
      %51 = vector.shape_cast %50 : vector<1x1x256xf32> to vector<1x256xf32>
      %52 = vector.shape_cast %49 : vector<1x256xf32> to vector<1x1x256xf32>
      tpu.vector_store %arg6[%c0_24, %c0_25, %c0_26], %52 {strides = array<i32>} : memref<1x1x256xf32, #tpu.memory_space<vmem>>, vector<1x1x256xf32>,
    } else {
    }
    return
  }
  func.func @transform_0(%arg0: i32, %arg1: i32) -> (i32, i32, i32) {
    %c0_i32 = arith.constant 0 : i32
    %c0_i32_0 = arith.constant 0 : i32
    return %arg0, %arg1, %c0_i32 : i32, i32, i32
  }
  func.func @transform_1(%arg0: i32, %arg1: i32) -> (i32, i32, i32) {
    %c0_i32 = arith.constant 0 : i32
    %c0_i32_0 = arith.constant 0 : i32
    %c0_i32_1 = arith.constant 0 : i32
    return %arg0, %c0_i32, %c0_i32_0 : i32, i32, i32
  }
  func.func @transform_2(%arg0: i32, %arg1: i32) -> (i32, i32) {
    %c0_i32 = arith.constant 0 : i32
    %c0_i32_0 = arith.constant 0 : i32
    %c0_i32_1 = arith.constant 0 : i32
    return %c0_i32, %c0_i32_0 : i32, i32
  }
  func.func @transform_3(%arg0: i32, %arg1: i32) -> (i32, i32) {
    %c0_i32 = arith.constant 0 : i32
    %c0_i32_0 = arith.constant 0 : i32
    %c0_i32_1 = arith.constant 0 : i32
    return %c0_i32, %c0_i32_0 : i32, i32
  }
  func.func @transform_4(%arg0: i32, %arg1: i32) -> (i32, i32, i32) {
    %c0_i32 = arith.constant 0 : i32
    %c0_i32_0 = arith.constant 0 : i32
    %c0_i32_1 = arith.constant 0 : i32
    return %arg0, %c0_i32, %c0_i32_0 : i32, i32, i32
  }
}

</mosaic_0001>

<bundles_post_ra>
// kernel: tpu_custom_call.1
= control target key start
LH: loop header
LB: loop body
LE: loop exit
PB: predicated region body
PF: predicated region fallthrough
CT: control target
= control target key end

     0   :  { %9 = vsyncpa [#allocation4], 0  ;;  %s2218_s0 = inlined_call_operand.vmem [shape: f32[2,256,4], index: 0, kind: input, shape index: {}]   ;;  %s2219_s1 = inlined_call_operand.vmem [shape: f32[2,4,256], index: 1, kind: input, shape index: {}]   ;;  %s2220_s2 = inlined_call_operand.vmem [shape: f32[1,4], index: 2, kind: input, shape index: {}]   ;;  %s2221_s3 = inlined_call_operand.vmem [shape: f32[4,1], index: 3, kind: input, shape index: {}]   ;;  %s2222_s4 = inlined_call_operand.hbm [shape: f32[2,1,256], index: 4, kind: output, shape index: {}]  }
   0x1   :  { %11 = vsyncpa [#allocation4 + $0x1], 0  ;;  %s1624_s15 = smov 0   ;;  %s1626_s16 = smov 0  }
   0x2   :  { %s1628_s17 = smov 0   ;;  %s1630_s18 = smov 0  }
   0x3   :  { %s1632_s19 = smov 0   ;;  %s1634_s20 = smov 0  }
   0x4   :  { %s1636_s21 = smov 0   ;;  %s1638_s22 = smov 0  }
   0x5 LB: > { %s1213_s23 = sadd.s32 4294967295, %s1591_s22   ;;  %s1214_s24 = sadd.s32 4294967294, %s1591_s22   ;;  %s1591_s22 = sphi %s1638_s22, %s17_s22   ;;  %s1587_s21 = sphi %s1636_s21, %s2238_s21   ;;  %s1583_s20 = sphi %s1634_s20, %s2237_s20   ;;  %s1579_s19 = sphi %s1632_s19, %s2236_s19   ;;  %s1575_s18 = sphi %s1630_s18, %s2235_s18   ;;  %s1571_s17 = sphi %s1628_s17, %s2234_s17   ;;  %s1567_s16 = sphi %s1626_s16, %s2233_s16   ;;  %s1563_s15 = sphi %s1624_s15, %s2232_s15  }
   0x6   : > { %s26_s25 = sadd.s32 1, %s1583_s20  ;;  %s29_s26 = sadd.s32 1, %s1587_s21 }
   0x7   : > { %p27_p0 = scmp.ge.s32.totalorder %s26_s25, 2  ;;  %p142_p1 = scmp.ne.s32.totalorder %s1571_s17, %s1567_s16 }
   0x8   : > { %p143_p2 = scmp.eq.s32.totalorder %s1213_s23, 3  ;;  %p148_p4 = scmp.ne.s32.totalorder %s1567_s16, %s1563_s15 }
   0x9   : > { %s2240_s25 = smov (%p27_p0, %s26_s25), 0  ;;  %s2242_s26 = smov (!%p27_p0, %s29_s26), %s1587_s21 }
   0xa   : > { %2225 = sst [smem:[#allocation6_spill]] %s2240_s25  ;;  %p1673_p3 = por %p143_p2, %p142_p1 }
   0xb   : > { %p31_p5 = scmp.ge.s32.totalorder %s2242_s26, 2  ;;  %p149_p6 = scmp.eq.s32.totalorder %s1214_s24, 3 }
   0xc   : > { %p1217_p7 = scmp.ge.s32.totalorder %s1591_s22, 1  ;;  %p194_p8 = scmp.lt.s32.totalorder %s1591_s22, 5 }
   0xd   : > { %s2244_s26 = smov (%p31_p5, %s2242_s26), 0  ;;  %p1683_p9 = por %p149_p6, %p148_p4 }
   0xe   : > { %2227 = sst [smem:[#allocation7_spill]] %s2244_s26  ;;  %p195_p10 = pnand %p1217_p7, %p194_p8 }
   0xf   : > { %s129_s29 = ssub.s32 %s1587_s21, %s2244_s26  ;;  %s132_s30 = sadd.s32 1, %s1571_s17 }
  0x10   : > { %p130_p11 = scmp.eq.s32.totalorder %s129_s29, 0  ;;  %198 = sbr.rel (%p195_p10) target bundleno = 1018 (0x3fa), region = 36 }
  0x11   : > { %s2224_s6 = sand.u32 (!%p195_p10), 1, %s1567_s16   ;;  %s1219_s7 = sshll.u32 (!%p195_p10), %s1575_s18, 4 }
  0x12   : > { %s1691_s5 = scalar_select %p130_p11, %s1571_s17, %s132_s30  }
  0x13   : > { %s1218_s8 = sshll.u32 (!%p195_p10), %s2224_s6, 1  ;;  %p230_p12 = scmp.lt.s32.totalorder (!%p195_p10), %s1579_s19, 1 }
  0x14   : > { %p232_p13 = scmp.lt.s32.totalorder (!%p195_p10), %s1219_s7, 31  ;;  %s1707_s25 = scalar_lea.vmem (!%p195_p10), [#allocation3], %s1218_s8 }
  0x15   : > { %p1224_p0 = scmp.ne.s32.totalorder (!%p195_p10), %s1575_s18, 0 }
  0x17   : > { %s231_s9 = scalar_select %p230_p12, %s1579_s19, 1 }
  0x18   : > { %s2246_s7 = smov (!%p232_p13, %s1219_s7), 31  ;;  %247 = sbr.rel (%p1224_p0) target bundleno = 194 (0xc2), region = 40 }
  0x19   : > { %s1220_s10 = sshll.u32 %s231_s9, 5  ;;  %s1251_s11 = sshll.u32 %s231_s9, 3  ;;  %v249_v0 = vld [vmem:[%s2221_s3] sm:$0xf] (!%p1224_p0)  ;;  %v1593_v1 = vmov (!%p1224_p0), 0   ;;  %v257_v4 = vlaneseq (!%p1224_p0)  ;;  %vm267_vm0 = vcmask (!%p1224_p0), 1043456  }
  0x1a   : > { %s235_s12 = sadd.s32 %s1220_s10, %s2246_s7  ;;  %s243_s23 = scalar_lea.vmem %s2219_s1, %s1251_s11  ;;  %1331 = vset.pattern.permute.xlu0 (!%p1224_p0), %v1593_v1  ;;  %v1594_v2 = vmov (!%p1224_p0), 839922192  }
  0x1b   : > { %s1221_s24 = sshll.u32 %s235_s12, 3  ;;  %252 = vperm.xlu0 (!%p1224_p0), %1331, %v249_v0   ;;  %v255_v3 = vunpack.c.l.s4 (!%p1224_p0), %v1594_v2  ;;  %v258_v6 = vshrl.u32 (!%p1224_p0), %v257_v4, 7  ;;  %v248_v9 = vld [vmem:[%s243_s23] sm:$0xff] (!%p1224_p0) }
  0x1c   : > { %s1705_s26 = scalar_lea.vmem %s2218_s0, %s1221_s24 }
  0x1d   : > { %v256_v5 = vunpack.c.0.s8 (!%p1224_p0), %v255_v3 }
  0x1f   : > { %v259_v7 = vsub.s32 %v256_v5, %v258_v6 }
  0x9a   : > { %v253_v8 = vpop.permute.xlu0 %252 }
  0x9b   : > { %v260_v10 = vrot.slane %v253_v8, %v259_v7 }
  0x9d   : > { %v262_v11 = vsub.f32 %v248_v9, %v260_v10 }
  0x9f   : > { %v263_v12 = vmul.f32 %v262_v11, %v262_v11 }
  0xa1   : > { %v265_v13 = vcombine.high %v263_v12, %v263_v12  ;;  %v268_v14 = vsel %vm267_vm0, %v263_v12, 0.0 }
  0xa2   : > { %v269_v15 = vrot.slane %v268_v14, 4 }
  0xa3   : > { %v275_v16 = vsel %vm267_vm0, %v265_v13, 0.0 }
  0xa4   : > { %v270_v17 = vadd.f32 %v269_v15, %v268_v14  ;;  %v276_v18 = vrot.slane %v275_v16, 4 }
  0xa6   : > { %v271_v19 = vrot.slane %v270_v17, 2  ;;  %v277_v20 = vadd.f32 %v276_v18, %v275_v16 }
  0xa8   : > { %v272_v21 = vadd.f32 %v271_v19, %v270_v17  ;;  %v278_v22 = vrot.slane %v277_v20, 2 }
  0xaa   : > { %v273_v23 = vrot.slane %v272_v21, 1  ;;  %v279_v24 = vadd.f32 %v278_v22, %v277_v20 }
  0xac   : > { %v274_v25 = vadd.f32 %v273_v23, %v272_v21  ;;  %v280_v26 = vrot.slane %v279_v24, 1 }
  0xae   : > { %v281_v27 = vadd.f32 %v280_v26, %v279_v24  ;;  %v282_v28 = vmax.f32 %v274_v25, 1e-24 }
  0xb0   : > { %v283_v29 = vmax.f32 %v281_v27, 1e-24  ;;  %1332 = vrsqrt.f32 %v282_v28 }
  0xb2   : > { %1334 = vrsqrt.f32 %v283_v29 }
  0xba   : > { %v1333_v30 = vpop.eup %1332 }
  0xbc   : > { %v1335_v31 = vpop.eup %1334 }
  0xbd   : > { %v288_v32 = vcombine.low %v1333_v30, %v1335_v31 }
  0xbf   : > { %v290_v33 = vmul.f32 %v288_v32, %v262_v11 }
  0xc1   : > { %291 = vst [vmem:[#allocation2] sm:$0xff] %v290_v33 }
  0xc2 PF: > { %v294_v34 = vld [vmem:[%s1705_s26 + $0x10] sm:$0xff]  ;;  %v1719_v35 = vld [vmem:[%s2220_s2] ss:$0 sm:$0xff]  ;;  %v293_v40 = vld [vmem:[%s1705_s26 + $0x8] sm:$0xff]  ;;  %vm347_vm1 = vcmask 31744   ;;  %vm495_vm2 = vcmask 1043456  }
  0xc3   : > { %v292_v36 = vld [vmem:[%s1705_s26] sm:$0xff]  ;;  %v1723_v37 = vsub.f32 %v294_v34, %v1719_v35  ;;  %v301_v41 = vld [vmem:[%s1705_s26 + $0x48] sm:$0xff]  ;;  %v1735_v43 = vsub.f32 %v293_v40, %v1719_v35  ;;  %v295_v44 = vld [vmem:[%s1705_s26 + $0x18] sm:$0xff] }
  0xc4   : > { %v1726_v38 = vsub.f32 %v292_v36, %v1719_v35  ;;  %v300_v39 = vld [vmem:[%s1705_s26 + $0x40] sm:$0xff]  ;;  %v1743_v47 = vsub.f32 %v301_v41, %v1719_v35  ;;  %v1746_v48 = vsub.f32 %v295_v44, %v1719_v35  ;;  %v302_v49 = vld [vmem:[%s1705_s26 + $0x50] sm:$0xff]  ;;  %v303_v61 = vld [vmem:[%s1705_s26 + $0x58] sm:$0xff] }
  0xc5   : > { %v1732_v42 = vsub.f32 %v300_v39, %v1719_v35  ;;  %v333_v45 = vmul.f32 %v1723_v37, %v1723_v37  ;;  %v296_v50 = vld [vmem:[%s1705_s26 + $0x20] sm:$0xff]  ;;  %v332_v52 = vmul.f32 %v1735_v43, %v1735_v43  ;;  %v1757_v55 = vsub.f32 %v302_v49, %v1719_v35  ;;  %v297_v62 = vld [vmem:[%s1705_s26 + $0x28] sm:$0xff]  ;;  %v298_v6 = vld [vmem:[%s1705_s26 + $0x30] sm:$0xff] }
  0xc6   : > { %v331_v46 = vmul.f32 %v1726_v38, %v1726_v38  ;;  %v1760_v56 = vsub.f32 %v296_v50, %v1719_v35  ;;  %v340_v59 = vmul.f32 %v1743_v47, %v1743_v47  ;;  %v334_v60 = vmul.f32 %v1746_v48, %v1746_v48  ;;  %v304_v5 = vld [vmem:[%s1705_s26 + $0x60] sm:$0xff]  ;;  %v305_v13 = vld [vmem:[%s1705_s26 + $0x68] sm:$0xff]  ;;  %v299_v14 = vld [vmem:[%s1705_s26 + $0x38] sm:$0xff] }
  0xc7   : > { %v339_v51 = vmul.f32 %v1732_v42, %v1732_v42  ;;  %v354_v53 = vsel %vm347_vm1, %v333_v45, 0.0  ;;  %v351_v58 = vsel %vm347_vm1, %v332_v52, 0.0  ;;  %v341_v63 = vmul.f32 %v1757_v55, %v1757_v55  ;;  %v306_v21 = vld [vmem:[%s1705_s26 + $0x70] sm:$0xff]  ;;  %v307_v22 = vld [vmem:[%s1705_s26 + $0x78] sm:$0xff] }
  0xc8   : > { %v348_v54 = vsel %vm347_vm1, %v331_v46, 0.0  ;;  %355 = vadd.xlane.f32.xlu1 %v354_v53  ;;  %v335_v0 = vmul.f32 %v1760_v56, %v1760_v56  ;;  %v375_v1 = vsel %vm347_vm1, %v340_v59, 0.0  ;;  %v357_v2 = vsel %vm347_vm1, %v334_v60, 0.0 }
  0xc9   : > { %349 = vadd.xlane.f32.xlu0 %v348_v54  ;;  %v372_v57 = vsel %vm347_vm1, %v339_v51, 0.0  ;;  %v1777_v3 = vsub.f32 %v303_v61, %v1719_v35  ;;  %v1780_v4 = vsub.f32 %v297_v62, %v1719_v35  ;;  %v378_v7 = vsel %vm347_vm1, %v341_v63, 0.0 }
  0xca   : > { %v360_v8 = vsel %vm347_vm1, %v335_v0, 0.0  ;;  %v1791_v11 = vsub.f32 %v304_v5, %v1719_v35  ;;  %v1794_v12 = vsub.f32 %v298_v6, %v1719_v35  ;;  %v1799_v15 = vsub.f32 %v305_v13, %v1719_v35 }
  0xcb   : > { %v342_v9 = vmul.f32 %v1777_v3, %v1777_v3  ;;  %v336_v10 = vmul.f32 %v1780_v4, %v1780_v4  ;;  %v1802_v16 = vsub.f32 %v299_v14, %v1719_v35  ;;  %v1815_v24 = vsub.f32 %v306_v21, %v1719_v35 }
  0xcc   : > { %373 = vadd.xlane.f32.xlu1 %v372_v57  ;;  %v343_v19 = vmul.f32 %v1791_v11, %v1791_v11  ;;  %v337_v20 = vmul.f32 %v1794_v12, %v1794_v12  ;;  %v344_v23 = vmul.f32 %v1799_v15, %v1799_v15  ;;  %v1822_v28 = vsub.f32 %v307_v22, %v1719_v35  ;;  %v444_v35 = vld [vmem:[#allocation2] sm:$0xff] }
  0xcd   : > { %352 = vadd.xlane.f32.xlu0 %v351_v58  ;;  %v381_v17 = vsel %vm347_vm1, %v342_v9, 0.0  ;;  %v363_v18 = vsel %vm347_vm1, %v336_v10, 0.0  ;;  %v338_v27 = vmul.f32 %v1802_v16, %v1802_v16  ;;  %v345_v31 = vmul.f32 %v1815_v24, %v1815_v24 }
  0xce   : > { %v384_v25 = vsel %vm347_vm1, %v343_v19, 0.0  ;;  %v366_v26 = vsel %vm347_vm1, %v337_v20, 0.0  ;;  %v387_v29 = vsel %vm347_vm1, %v344_v23, 0.0  ;;  %v346_v32 = vmul.f32 %v1822_v28, %v1822_v28 }
  0xcf   : > { %v369_v30 = vsel %vm347_vm1, %v338_v27, 0.0  ;;  %v390_v33 = vsel %vm347_vm1, %v345_v31, 0.0  ;;  %v446_v36 = vcombine.high %v444_v35, %v444_v35  ;;  %v1595_v39 = vmov 0.0  }
  0xd0   : > { %376 = vadd.xlane.f32.xlu1 %v375_v1  ;;  %v393_v34 = vsel %vm347_vm1, %v346_v32, 0.0  ;;  %564 = vmatprep.mubr.f32.mxu0 %v1595_v39 }
  0xd1   : > { %358 = vadd.xlane.f32.xlu0 %v357_v2  ;;  %1226 = vmatprep.subr.msk.mxu0 %vm495_vm2, %v446_v36 }
  0xd2   : > { %1227 = vmatpush1.msk.msra.mxu0 %vm495_vm2, %v444_v35  ;;  %1253 = vmatprep.subr.msk.mxu1 %vm495_vm2, %v446_v36 }
  0xd3   : > { %1254 = vmatpush1.msk.msra.mxu1 %vm495_vm2, %v444_v35  ;;  %612 = vmatprep.mubr.f32.mxu1 %v1595_v39 }
  0xd4   : > { %379 = vadd.xlane.f32.xlu1 %v378_v7 }
  0xd5   : > { %361 = vadd.xlane.f32.xlu0 %v360_v8 }
  0xd8   : > { %382 = vadd.xlane.f32.xlu1 %v381_v17 }
  0xd9   : > { %364 = vadd.xlane.f32.xlu0 %v363_v18 }
  0xdc   : > { %385 = vadd.xlane.f32.xlu1 %v384_v25 }
  0xdd   : > { %367 = vadd.xlane.f32.xlu0 %v366_v26 }
  0xe0   : > { %388 = vadd.xlane.f32.xlu1 %v387_v29 }
  0xe1   : > { %370 = vadd.xlane.f32.xlu0 %v369_v30 }
  0xe4   : > { %394 = vadd.xlane.f32.xlu1 %v393_v34 }
  0xe5   : > { %391 = vadd.xlane.f32.xlu0 %v390_v33 }
 0x155   : > { %v356_v40 = vpop.xlane.xlu1 %355 }
 0x156   : > { %v350_v41 = vpop.xlane.xlu0 %349  ;;  %v398_v51 = vmax.f32 %v356_v40, 1e-24 }
 0x157   : > { %v396_v44 = vmax.f32 %v350_v41, 1e-24 }
 0x159   : > { %1337 = vrsqrt.f32 %v396_v44  ;;  %v374_v45 = vpop.xlane.xlu1 %373 }
 0x15a   : > { %v353_v46 = vpop.xlane.xlu0 %352  ;;  %v404_v49 = vmax.f32 %v374_v45, 1e-24 }
 0x15b   : > { %v397_v50 = vmax.f32 %v353_v46, 1e-24 }
 0x15c   : > { %1339 = vrsqrt.f32 %v404_v49 }
 0x15d   : > { %1341 = vrsqrt.f32 %v397_v50  ;;  %v377_v52 = vpop.xlane.xlu1 %376 }
 0x15e   : > { %v359_v53 = vpop.xlane.xlu0 %358  ;;  %v405_v54 = vmax.f32 %v377_v52, 1e-24  ;;  %1343 = vrsqrt.f32 %v398_v51 }
 0x15f   : > { %v399_v57 = vmax.f32 %v359_v53, 1e-24 }
 0x160   : > { %1345 = vrsqrt.f32 %v405_v54 }
 0x161   : > { %1347 = vrsqrt.f32 %v399_v57  ;;  %v380_v58 = vpop.xlane.xlu1 %379 }
 0x162   : > { %v362_v59 = vpop.xlane.xlu0 %361  ;;  %v406_v60 = vmax.f32 %v380_v58, 1e-24 }
 0x163   : > { %v400_v61 = vmax.f32 %v362_v59, 1e-24  ;;  %v1338_v62 = vpop.eup %1337 }
 0x164   : > { %1349 = vrsqrt.f32 %v406_v60  ;;  %v428_v63 = vmul.f32 %v1338_v62, %v1726_v38 }
 0x165   : > { %1351 = vrsqrt.f32 %v400_v61  ;;  %v383_v0 = vpop.xlane.xlu1 %382 }
 0x166   : > { %v365_v1 = vpop.xlane.xlu0 %364  ;;  %v1340_v2 = vpop.eup %1339  ;;  %v407_v5 = vmax.f32 %v383_v0, 1e-24  ;;  %1228 = vmatmul.mubr.msk.f32.vlgmr.msra.gmra.mrb[0].mxu0 %vm347_vm1, %v428_v63 }
 0x167   : > { %v401_v6 = vmax.f32 %v365_v1, 1e-24  ;;  %v1342_v7 = vpop.eup %1341  ;;  %570 = vmatprep.mubr.f32.mxu0 %v1595_v39  ;;  %v436_v8 = vmul.f32 %v1340_v2, %v1732_v42 }
 0x168   : > { %1353 = vrsqrt.f32 %v407_v5  ;;  %v429_v9 = vmul.f32 %v1342_v7, %v1735_v43  ;;  %v1344_v10 = vpop.eup %1343 }
 0x169   : > { %1355 = vrsqrt.f32 %v401_v6  ;;  %1236 = vmatmul.mubr.msk.f32.vlgmr.msra.gmra.mrb[0].mxu1 %vm347_vm1, %v436_v8  ;;  %v386_v38 = vpop.xlane.xlu1 %385  ;;  %v430_v43 = vmul.f32 %v1344_v10, %v1723_v37 }
 0x16a   : > { %v368_v13 = vpop.xlane.xlu0 %367  ;;  %v1346_v14 = vpop.eup %1345  ;;  %1229 = vmatmul.mubr.msk.f32.gmra.mrb[2].mxu0 %vm347_vm1, %v429_v9  ;;  %618 = vmatprep.mubr.f32.mxu1 %v1595_v39  ;;  %v408_v17 = vmax.f32 %v386_v38, 1e-24 }
 0x16b   : > { %v402_v18 = vmax.f32 %v368_v13, 1e-24  ;;  %v1348_v19 = vpop.eup %1347  ;;  %576 = vmatprep.mubr.f32.mxu0 %v1595_v39  ;;  %v437_v42 = vmul.f32 %v1346_v14, %v1743_v47 }
 0x16c   : > { %1357 = vrsqrt.f32 %v408_v17  ;;  %v431_v26 = vmul.f32 %v1348_v19, %v1746_v48 }
 0x16d   : > { %1359 = vrsqrt.f32 %v402_v18  ;;  %1237 = vmatmul.mubr.msk.f32.gmra.mrb[2].mxu1 %vm347_vm1, %v437_v42  ;;  %v389_v20 = vpop.xlane.xlu1 %388 }
 0x16e   : > { %v371_v21 = vpop.xlane.xlu0 %370  ;;  %v1350_v22 = vpop.eup %1349  ;;  %1230 = vmatmul.mubr.msk.f32.gmra.mrb[4].mxu0 %vm347_vm1, %v430_v43  ;;  %624 = vmatprep.mubr.f32.mxu1 %v1595_v39  ;;  %v409_v23 = vmax.f32 %v389_v20, 1e-24 }
 0x16f   : > { %v403_v25 = vmax.f32 %v371_v21, 1e-24  ;;  %v1352_v27 = vpop.eup %1351  ;;  %582 = vmatprep.mubr.f32.mxu0 %v1595_v39  ;;  %v438_v47 = vmul.f32 %v1350_v22, %v1757_v55 }
 0x170   : > { %1361 = vrsqrt.f32 %v409_v23  ;;  %v432_v32 = vmul.f32 %v1352_v27, %v1760_v56 }
 0x171   : > { %1363 = vrsqrt.f32 %v403_v25  ;;  %1238 = vmatmul.mubr.msk.f32.gmra.mrb[4].mxu1 %vm347_vm1, %v438_v47  ;;  %v395_v29 = vpop.xlane.xlu1 %394 }
 0x172   : > { %v392_v37 = vpop.xlane.xlu0 %391  ;;  %v1354_v30 = vpop.eup %1353  ;;  %1231 = vmatmul.mubr.msk.f32.gmra.mrb[6].mxu0 %vm347_vm1, %v431_v26  ;;  %630 = vmatprep.mubr.f32.mxu1 %v1595_v39  ;;  %v411_v48 = vmax.f32 %v395_v29, 1e-24 }
 0x173   : > { %v410_v31 = vmax.f32 %v392_v37, 1e-24  ;;  %v1356_v33 = vpop.eup %1355  ;;  %588 = vmatprep.mubr.f32.mxu0 %v1595_v39  ;;  %v439_v55 = vmul.f32 %v1354_v30, %v1777_v3 }
 0x174   : > { %v433_v35 = vmul.f32 %v1356_v33, %v1780_v4 }
 0x175   : > { %1365 = vrsqrt.f32 %v410_v31  ;;  %1239 = vmatmul.mubr.msk.f32.gmra.mrb[6].mxu1 %vm347_vm1, %v439_v55 }
 0x176   : > { %1367 = vrsqrt.f32 %v411_v48  ;;  %v1358_v34 = vpop.eup %1357  ;;  %1232 = vmatmul.mubr.msk.f32.gmra.mrb[8].mxu0 %vm347_vm1, %v432_v32  ;;  %636 = vmatprep.mubr.f32.mxu1 %v1595_v39 }
 0x177   : > { %v1360_v36 = vpop.eup %1359  ;;  %594 = vmatprep.mubr.f32.mxu0 %v1595_v39  ;;  %v440_v56 = vmul.f32 %v1358_v34, %v1791_v11 }
 0x178   : > { %v434_v3 = vmul.f32 %v1360_v36, %v1794_v12 }
 0x179   : > { %1240 = vmatmul.mubr.msk.f32.gmra.mrb[8].mxu1 %vm347_vm1, %v440_v56 }
 0x17a   : > { %v1362_v40 = vpop.eup %1361  ;;  %1233 = vmatmul.mubr.msk.f32.gmra.mrb[10].mxu0 %vm347_vm1, %v433_v35  ;;  %642 = vmatprep.mubr.f32.mxu1 %v1595_v39 }
 0x17b   : > { %v1364_v41 = vpop.eup %1363  ;;  %600 = vmatprep.mubr.f32.mxu0 %v1595_v39  ;;  %v441_v4 = vmul.f32 %v1362_v40, %v1799_v15 }
 0x17c   : > { %v435_v11 = vmul.f32 %v1364_v41, %v1802_v16 }
 0x17d   : > { %1241 = vmatmul.mubr.msk.f32.gmra.mrb[10].mxu1 %vm347_vm1, %v441_v4 }
 0x17e   : > { %1234 = vmatmul.mubr.msk.f32.gmra.mrb[12].mxu0 %vm347_vm1, %v434_v3  ;;  %648 = vmatprep.mubr.f32.mxu1 %v1595_v39 }
 0x17f   : > { %v1366_v44 = vpop.eup %1365  ;;  %606 = vmatprep.mubr.f32.mxu0 %v1595_v39 }
 0x180   : > { %v1368_v45 = vpop.eup %1367  ;;  %v442_v12 = vmul.f32 %v1366_v44, %v1815_v24 }
 0x181   : > { %v443_v46 = vmul.f32 %v1368_v45, %v1822_v28 }
 0x182   : > { %1242 = vmatmul.mubr.msk.f32.gmra.mrb[12].mxu1 %vm347_vm1, %v442_v12  ;;  %1235 = vmatmul.mubr.msk.f32.gmra.mrb[14].mxu0 %vm347_vm1, %v435_v11 }
 0x183   : > { %654 = vmatprep.mubr.f32.mxu1 %v1595_v39 }
 0x186   : > { %1243 = vmatmul.mubr.msk.f32.gmra.mrb[14].mxu1 %vm347_vm1, %v443_v46 }
 0x239   : > { %v1880_v15 = vpop.f32.mrb[0].mxu0 }
 0x23a   : > { %v1882_v16 = vpop.f32.mrb[1].mxu0 }
 0x23b   : > { %v661_v49 = vmax.f32 %v1880_v15, %v1882_v16 }
 0x23c   : > { %v1886_v50 = vpop.f32.mrb[0].mxu1 }
 0x23d   : > { %662 = vmax.xlane.f32.xlu0 %v661_v49  ;;  %v1888_v24 = vpop.f32.mrb[2].mxu0  ;;  %v1890_v51 = vpop.f32.mrb[1].mxu1 }
 0x23e   : > { %v1892_v28 = vpop.f32.mrb[3].mxu0  ;;  %v685_v39 = vmax.f32 %v1886_v50, %v1890_v51 }
 0x23f   : > { %v664_v52 = vmax.f32 %v1888_v24, %v1892_v28 }
 0x240   : > { %v1898_v53 = vpop.f32.mrb[2].mxu1 }
 0x241   : > { %686 = vmax.xlane.f32.xlu0 %v685_v39  ;;  %665 = vmax.xlane.f32.xlu1 %v664_v52  ;;  %v1900_v54 = vpop.f32.mrb[4].mxu0  ;;  %v1902_v57 = vpop.f32.mrb[3].mxu1  ;;  %v789_v52 = vsub.f32 1.0, %v1880_v15 }
 0x242   : > { %v1904_v58 = vpop.f32.mrb[5].mxu0  ;;  %v688_v59 = vmax.f32 %v1898_v53, %v1902_v57 }
 0x243   : > { %v667_v60 = vmax.f32 %v1900_v54, %v1904_v58 }
 0x244   : > { %v1910_v61 = vpop.f32.mrb[4].mxu1 }
 0x245   : > { %689 = vmax.xlane.f32.xlu1 %v688_v59  ;;  %668 = vmax.xlane.f32.xlu0 %v667_v60  ;;  %v1912_v62 = vpop.f32.mrb[6].mxu0  ;;  %v1914_v63 = vpop.f32.mrb[5].mxu1  ;;  %v790_v59 = vsub.f32 1.0, %v1882_v16 }
 0x246   : > { %v1916_v0 = vpop.f32.mrb[7].mxu0  ;;  %v691_v1 = vmax.f32 %v1910_v61, %v1914_v63 }
 0x247   : > { %v670_v2 = vmax.f32 %v1912_v62, %v1916_v0 }
 0x248   : > { %v1922_v5 = vpop.f32.mrb[6].mxu1 }
 0x249   : > { %692 = vmax.xlane.f32.xlu0 %v691_v1  ;;  %671 = vmax.xlane.f32.xlu1 %v670_v2  ;;  %v1924_v6 = vpop.f32.mrb[8].mxu0  ;;  %v1926_v7 = vpop.f32.mrb[7].mxu1 }
 0x24a   : > { %v1928_v8 = vpop.f32.mrb[9].mxu0  ;;  %v694_v9 = vmax.f32 %v1922_v5, %v1926_v7 }
 0x24b   : > { %v673_v10 = vmax.f32 %v1924_v6, %v1928_v8 }
 0x24c   : > { %v1934_v38 = vpop.f32.mrb[8].mxu1 }
 0x24d   : > { %695 = vmax.xlane.f32.xlu1 %v694_v9  ;;  %674 = vmax.xlane.f32.xlu0 %v673_v10  ;;  %v1936_v13 = vpop.f32.mrb[10].mxu0  ;;  %v1938_v14 = vpop.f32.mrb[9].mxu1 }
 0x24e   : > { %v1940_v17 = vpop.f32.mrb[11].mxu0  ;;  %v697_v18 = vmax.f32 %v1934_v38, %v1938_v14 }
 0x24f   : > { %v676_v19 = vmax.f32 %v1936_v13, %v1940_v17 }
 0x250   : > { %v1946_v42 = vpop.f32.mrb[10].mxu1 }
 0x251   : > { %677 = vmax.xlane.f32.xlu1 %v676_v19  ;;  %v1948_v43 = vpop.f32.mrb[12].mxu0  ;;  %v1950_v20 = vpop.f32.mrb[11].mxu1  ;;  %v805_v19 = vsub.f32 1.0, %v1886_v50 }
 0x252   : > { %v1952_v21 = vpop.f32.mrb[13].mxu0  ;;  %v700_v22 = vmax.f32 %v1946_v42, %v1950_v20 }
 0x253   : > { %v679_v23 = vmax.f32 %v1948_v43, %v1952_v21 }
 0x255   : > { %v1958_v25 = vpop.f32.mrb[12].mxu1  ;;  %680 = vmax.xlane.f32.xlu0 %v679_v23  ;;  %v1960_v26 = vpop.f32.mrb[14].mxu0  ;;  %v792_v23 = vsub.f32 1.0, %v1892_v28 }
 0x256   : > { %v1962_v27 = vpop.f32.mrb[13].mxu1  ;;  %v1964_v47 = vpop.f32.mrb[15].mxu0 }
 0x257   : > { %v703_v37 = vmax.f32 %v1958_v25, %v1962_v27  ;;  %v682_v29 = vmax.f32 %v1960_v26, %v1964_v47 }
 0x259   : > { %v1970_v30 = vpop.f32.mrb[14].mxu1  ;;  %698 = vmax.xlane.f32.xlu0 %v697_v18  ;;  %683 = vmax.xlane.f32.xlu1 %v682_v29  ;;  %v807_v29 = vsub.f32 1.0, %v1898_v53  ;;  %v795_v53 = vsub.f32 1.0, %v1912_v62 }
 0x25a   : > { %v1972_v31 = vpop.f32.mrb[15].mxu1 }
 0x25b   : > { %v706_v32 = vmax.f32 %v1970_v30, %v1972_v31 }
 0x25d   : > { %701 = vmax.xlane.f32.xlu1 %v700_v22  ;;  %704 = vmax.xlane.f32.xlu0 %v703_v37  ;;  %v791_v22 = vsub.f32 1.0, %v1888_v24  ;;  %v806_v37 = vsub.f32 1.0, %v1890_v51  ;;  %v809_v51 = vsub.f32 1.0, %v1910_v61 }
 0x261   : > { %707 = vmax.xlane.f32.xlu1 %v706_v32  ;;  %v793_v32 = vsub.f32 1.0, %v1900_v54 }
 0x2ca   : > { %v663_v48 = vpop.xlane.xlu0 %662 }
 0x2cb   : > { %v709_v33 = vsub.f32 1.0, %v663_v48  ;;  %v794_v48 = vsub.f32 1.0, %v1904_v58 }
 0x2cd   : > { %v725_v55 = vadd.f32 1e-05, %v709_v33  ;;  %v808_v33 = vsub.f32 1.0, %v1902_v57 }
 0x2ce   : > { %v666_v34 = vpop.xlane.xlu1 %665  ;;  %v687_v35 = vpop.xlane.xlu0 %686 }
 0x2cf   : > { %v741_v36 = vmul.f32 0.5, %v725_v55  ;;  %v710_v56 = vsub.f32 1.0, %v666_v34  ;;  %v717_v40 = vsub.f32 1.0, %v687_v35 }
 0x2d1   : > { %1369 = vrcp.f32 %v741_v36  ;;  %v726_v3 = vadd.f32 1e-05, %v710_v56  ;;  %v733_v41 = vadd.f32 1e-05, %v717_v40  ;;  %v810_v56 = vsub.f32 1.0, %v1914_v63 }
 0x2d2   : > { %v690_v4 = vpop.xlane.xlu1 %689  ;;  %v669_v44 = vpop.xlane.xlu0 %668 }
 0x2d3   : > { %v742_v11 = vmul.f32 0.5, %v726_v3  ;;  %v749_v45 = vmul.f32 0.5, %v733_v41  ;;  %v718_v12 = vsub.f32 1.0, %v690_v4  ;;  %v711_v46 = vsub.f32 1.0, %v669_v44 }
 0x2d4   : > { %v796_v3 = vsub.f32 1.0, %v1916_v0  ;;  %v811_v4 = vsub.f32 1.0, %v1922_v5 }
 0x2d5   : > { %1371 = vrcp.f32 %v742_v11  ;;  %v734_v49 = vadd.f32 1e-05, %v718_v12  ;;  %v727_v39 = vadd.f32 1e-05, %v711_v46  ;;  %v797_v46 = vsub.f32 1.0, %v1924_v6 }
 0x2d6   : > { %1373 = vrcp.f32 %v749_v45  ;;  %v672_v60 = vpop.xlane.xlu1 %671  ;;  %v693_v1 = vpop.xlane.xlu0 %692 }
 0x2d7   : > { %v750_v2 = vmul.f32 0.5, %v734_v49  ;;  %v743_v9 = vmul.f32 0.5, %v727_v39  ;;  %v712_v10 = vsub.f32 1.0, %v672_v60  ;;  %v719_v18 = vsub.f32 1.0, %v693_v1 }
 0x2d8   : > { %v812_v49 = vsub.f32 1.0, %v1926_v7 }
 0x2d9   : > { %1375 = vrcp.f32 %v750_v2  ;;  %v728_v15 = vadd.f32 1e-05, %v712_v10  ;;  %v735_v16 = vadd.f32 1e-05, %v719_v18 }
 0x2da   : > { %1377 = vrcp.f32 %v743_v9  ;;  %v696_v55 = vpop.xlane.xlu1 %695  ;;  %v675_v50 = vpop.xlane.xlu0 %674 }
 0x2db   : > { %v1370_v34 = vpop.eup %1369  ;;  %v744_v24 = vmul.f32 0.5, %v728_v15  ;;  %v751_v35 = vmul.f32 0.5, %v735_v16  ;;  %v720_v28 = vsub.f32 1.0, %v696_v55  ;;  %v713_v36 = vsub.f32 1.0, %v675_v50 }
 0x2dc   : > { %v773_v40 = vsub.f32 0.0, %v1370_v34  ;;  %v798_v15 = vsub.f32 1.0, %v1928_v8 }
 0x2dd   : > { %1379 = vrcp.f32 %v744_v24  ;;  %v736_v41 = vadd.f32 1e-05, %v720_v28  ;;  %v729_v57 = vadd.f32 1e-05, %v713_v36 }
 0x2de   : > { %v821_v44 = vmul.f32 %v789_v52, %v773_v40  ;;  %v822_v11 = vmul.f32 %v790_v59, %v773_v40  ;;  %1381 = vrcp.f32 %v751_v35  ;;  %v678_v45 = vpop.xlane.xlu1 %677  ;;  %v799_v59 = vsub.f32 1.0, %v1936_v13 }
 0x2df   : > { %v1372_v12 = vpop.eup %1371  ;;  %v752_v39 = vmul.f32 0.5, %v736_v41  ;;  %v714_v60 = vsub.f32 1.0, %v678_v45  ;;  %v745_v18 = vmul.f32 0.5, %v729_v57 }
 0x2e0   : > { %v1374_v1 = vpop.eup %1373  ;;  %v853_v2 = vmul.f32 1.442695, %v821_v44  ;;  %v855_v9 = vmul.f32 1.442695, %v822_v11  ;;  %v774_v10 = vsub.f32 0.0, %v1372_v12 }
 0x2e1   : > { %v781_v16 = vsub.f32 0.0, %v1374_v1  ;;  %1383 = vrcp.f32 %v752_v39  ;;  %v730_v52 = vadd.f32 1e-05, %v714_v60 }
 0x2e2   : > { %1385 = vpow2.f32 %v853_v2  ;;  %v823_v55 = vmul.f32 %v791_v22, %v774_v10  ;;  %v824_v50 = vmul.f32 %v792_v23, %v774_v10  ;;  %v681_v36 = vpop.xlane.xlu0 %680 }
 0x2e3   : > { %v1376_v34 = vpop.eup %1375  ;;  %1387 = vpow2.f32 %v855_v9  ;;  %v837_v24 = vmul.f32 %v805_v19, %v781_v16  ;;  %v838_v35 = vmul.f32 %v806_v37, %v781_v16  ;;  %v746_v28 = vmul.f32 0.5, %v730_v52 }
 0x2e4   : > { %v1378_v40 = vpop.eup %1377  ;;  %v857_v41 = vmul.f32 1.442695, %v823_v55  ;;  %v859_v44 = vmul.f32 1.442695, %v824_v50  ;;  %v782_v57 = vsub.f32 0.0, %v1376_v34  ;;  %1389 = vrcp.f32 %v745_v18 }
 0x2e5   : > { %v885_v11 = vmul.f32 1.442695, %v837_v24  ;;  %v887_v45 = vmul.f32 1.442695, %v838_v35  ;;  %v775_v12 = vsub.f32 0.0, %v1378_v40  ;;  %1391 = vrcp.f32 %v746_v28 }
 0x2e6   : > { %1393 = vpow2.f32 %v857_v41  ;;  %v839_v39 = vmul.f32 %v807_v29, %v782_v57  ;;  %v840_v60 = vmul.f32 %v808_v33, %v782_v57  ;;  %v715_v22 = vsub.f32 1.0, %v681_v36  ;;  %v684_v23 = vpop.xlane.xlu1 %683  ;;  %v699_v28 = vpop.xlane.xlu0 %698 }
 0x2e7   : > { %v1380_v1 = vpop.eup %1379  ;;  %1395 = vpow2.f32 %v859_v44  ;;  %v825_v19 = vmul.f32 %v793_v32, %v775_v12  ;;  %v826_v37 = vmul.f32 %v794_v48, %v775_v12  ;;  %v716_v2 = vsub.f32 1.0, %v684_v23 }
 0x2e8   : > { %v1382_v9 = vpop.eup %1381  ;;  %1397 = vpow2.f32 %v885_v11  ;;  %v889_v10 = vmul.f32 1.442695, %v839_v39  ;;  %v891_v18 = vmul.f32 1.442695, %v840_v60  ;;  %v776_v16 = vsub.f32 0.0, %v1380_v1 }
 0x2e9   : > { %1399 = vpow2.f32 %v887_v45  ;;  %v861_v52 = vmul.f32 1.442695, %v825_v19  ;;  %v863_v29 = vmul.f32 1.442695, %v826_v37  ;;  %v783_v33 = vsub.f32 0.0, %v1382_v9 }
 0x2ea   : > { %1401 = vpow2.f32 %v889_v10  ;;  %v827_v55 = vmul.f32 %v795_v53, %v776_v16  ;;  %v828_v54 = vmul.f32 %v796_v3, %v776_v16  ;;  %v731_v32 = vadd.f32 1e-05, %v715_v22  ;;  %v702_v0 = vpop.xlane.xlu1 %701  ;;  %v705_v37 = vpop.xlane.xlu0 %704 }
 0x2eb   : > { %v1384_v58 = vpop.eup %1383  ;;  %v800_v48 = vsub.f32 1.0, %v1940_v17  ;;  %1403 = vpow2.f32 %v891_v18  ;;  %v841_v50 = vmul.f32 %v809_v51, %v783_v33  ;;  %v842_v34 = vmul.f32 %v810_v56, %v783_v33 }
 0x2ec   : > { %v2008_v24 = vpop.eup %1385  ;;  %1405 = vpow2.f32 %v861_v52  ;;  %v865_v35 = vmul.f32 1.442695, %v827_v55  ;;  %v867_v62 = vmul.f32 1.442695, %v828_v54  ;;  %v784_v53 = vsub.f32 0.0, %v1384_v58 }
 0x2ed   : > { %v2010_v3 = vpop.eup %1387  ;;  %1407 = vpow2.f32 %v863_v29  ;;  %v893_v36 = vmul.f32 1.442695, %v841_v50  ;;  %v895_v17 = vmul.f32 1.442695, %v842_v34  ;;  %v732_v40 = vadd.f32 1e-05, %v716_v2 }
 0x2ee   : > { %v1390_v41 = vpop.eup %1389  ;;  %1409 = vpow2.f32 %v865_v35  ;;  %v843_v61 = vmul.f32 %v811_v4, %v784_v53  ;;  %v844_v63 = vmul.f32 %v812_v49, %v784_v53  ;;  %v747_v51 = vmul.f32 0.5, %v731_v32  ;;  %v708_v2 = vpop.xlane.xlu1 %707 }
 0x2ef   : > { %v1392_v56 = vpop.eup %1391  ;;  %1411 = vpow2.f32 %v867_v62  ;;  %v777_v44 = vsub.f32 0.0, %v1390_v41  ;;  %v721_v57 = vsub.f32 1.0, %v699_v28  ;;  %v722_v11 = vsub.f32 1.0, %v702_v0 }
 0x2f0   : > { %v2016_v45 = vpop.eup %1393  ;;  %1413 = vpow2.f32 %v893_v36  ;;  %v897_v12 = vmul.f32 1.442695, %v843_v61  ;;  %v899_v39 = vmul.f32 1.442695, %v844_v63  ;;  %v778_v60 = vsub.f32 0.0, %v1392_v56 }
 0x2f1   : > { %v2018_v22 = vpop.eup %1395  ;;  %1415 = vpow2.f32 %v895_v17  ;;  %v829_v5 = vmul.f32 %v797_v46, %v777_v44  ;;  %v830_v7 = vmul.f32 %v798_v15, %v777_v44  ;;  %v737_v4 = vadd.f32 1e-05, %v721_v57 }
 0x2f2   : > { %v2024_v49 = vpop.eup %1397  ;;  %1417 = vpow2.f32 %v897_v12  ;;  %v831_v23 = vmul.f32 %v799_v59, %v778_v60  ;;  %v832_v1 = vmul.f32 %v800_v48, %v778_v60  ;;  %v738_v19 = vadd.f32 1e-05, %v722_v11 }
 0x2f3   : > { %v2028_v9 = vpop.eup %1399  ;;  %1419 = vpow2.f32 %v899_v39  ;;  %v869_v10 = vmul.f32 1.442695, %v829_v5  ;;  %v871_v6 = vmul.f32 1.442695, %v830_v7  ;;  %v748_v18 = vmul.f32 0.5, %v732_v40 }
 0x2f4   : > { %v2030_v46 = vpop.eup %1401  ;;  %v873_v8 = vmul.f32 1.442695, %v831_v23  ;;  %v875_v15 = vmul.f32 1.442695, %v832_v1  ;;  %1421 = vrcp.f32 %v747_v51  ;;  %v723_v13 = vsub.f32 1.0, %v705_v37 }
 0x2f5   : > { %v2032_v16 = vpop.eup %1403  ;;  %1423 = vpow2.f32 %v869_v10  ;;  %v724_v59 = vsub.f32 1.0, %v708_v2  ;;  %v917_v52 = vadd.f32 %v2010_v3, %v2008_v24  ;;  %v753_v33 = vmul.f32 0.5, %v737_v4 }
 0x2f6   : > { %v2036_v29 = vpop.eup %1405  ;;  %1425 = vpow2.f32 %v871_v6  ;;  %v754_v55 = vmul.f32 0.5, %v738_v19  ;;  %v920_v54 = vadd.f32 %v2018_v22, %v2016_v45  ;;  %v739_v58 = vadd.f32 1e-05, %v723_v13 }
 0x2f7   : > { %v2040_v32 = vpop.eup %1407  ;;  %1427 = vpow2.f32 %v873_v8  ;;  %v740_v48 = vadd.f32 1e-05, %v724_v59  ;;  %918 = vadd.xlane.f32.xlu0 %v917_v52  ;;  %v941_v50 = vadd.f32 %v2028_v9, %v2024_v49  ;;  %v944_v35 = vadd.f32 %v2032_v16, %v2030_v46 }
 0x2f8   : > { %v2044_v34 = vpop.eup %1409  ;;  %1429 = vpow2.f32 %v875_v15  ;;  %921 = vadd.xlane.f32.xlu1 %v920_v54  ;;  %v755_v53 = vmul.f32 0.5, %v739_v58  ;;  %v923_v17 = vadd.f32 %v2040_v32, %v2036_v29  ;;  %v801_v56 = vsub.f32 1.0, %v1948_v43 }
 0x2f9   : > { %v2048_v62 = vpop.eup %1411  ;;  %1431 = vrcp.f32 %v748_v18  ;;  %v756_v28 = vmul.f32 0.5, %v740_v48  ;;  %v802_v44 = vsub.f32 1.0, %v1952_v21  ;;  %v813_v43 = vsub.f32 1.0, %v1934_v38 }
 0x2fa   : > { %v2050_v0 = vpop.eup %1413  ;;  %1433 = vrcp.f32 %v753_v33  ;;  %v926_v41 = vadd.f32 %v2048_v62, %v2044_v34  ;;  %v814_v21 = vsub.f32 1.0, %v1938_v14  ;;  %v815_v23 = vsub.f32 1.0, %v1946_v42 }
 0x2fb   : > { %v2052_v36 = vpop.eup %1415  ;;  %1435 = vrcp.f32 %v754_v55  ;;  %942 = vadd.xlane.f32.xlu0 %v941_v50  ;;  %v816_v19 = vsub.f32 1.0, %v1950_v20  ;;  %v803_v8 = vsub.f32 1.0, %v1960_v26  ;;  %v804_v15 = vsub.f32 1.0, %v1964_v47 }
 0x2fc   : > { %v2056_v40 = vpop.eup %1417  ;;  %1437 = vrcp.f32 %v755_v53  ;;  %945 = vadd.xlane.f32.xlu1 %v944_v35  ;;  %v947_v11 = vadd.f32 %v2052_v36, %v2050_v0  ;;  %v817_v42 = vsub.f32 1.0, %v1958_v25  ;;  %v818_v20 = vsub.f32 1.0, %v1962_v27 }
 0x2fd   : > { %v2060_v61 = vpop.eup %1419  ;;  %1439 = vrcp.f32 %v756_v28  ;;  %v819_v47 = vsub.f32 1.0, %v1970_v30 }
 0x2fe   : > { %v1422_v63 = vpop.eup %1421  ;;  %v950_v39 = vadd.f32 %v2060_v61, %v2056_v40 }
 0x2ff   : > { %v2062_v51 = vpop.eup %1423  ;;  %v779_v57 = vsub.f32 0.0, %v1422_v63  ;;  %924 = vadd.xlane.f32.xlu0 %v923_v17  ;;  %v820_v63 = vsub.f32 1.0, %v1972_v31 }
 0x300   : > { %v2068_v12 = vpop.eup %1425  ;;  %927 = vadd.xlane.f32.xlu1 %v926_v41 }
 0x301   : > { %v2072_v60 = vpop.eup %1427  ;;  %v833_v5 = vmul.f32 %v801_v56, %v779_v57  ;;  %v834_v7 = vmul.f32 %v802_v44, %v779_v57  ;;  %v929_v10 = vadd.f32 %v2068_v12, %v2062_v51 }
 0x302   : > { %v2074_v4 = vpop.eup %1429 }
 0x303   : > { %v1432_v1 = vpop.eup %1431  ;;  %v877_v37 = vmul.f32 1.442695, %v833_v5  ;;  %v879_v2 = vmul.f32 1.442695, %v834_v7  ;;  %948 = vadd.xlane.f32.xlu0 %v947_v11  ;;  %v932_v38 = vadd.f32 %v2074_v4, %v2072_v60 }
 0x304   : > { %v1434_v6 = vpop.eup %1433  ;;  %v780_v18 = vsub.f32 0.0, %v1432_v1  ;;  %951 = vadd.xlane.f32.xlu1 %v950_v39 }
 0x305   : > { %v1436_v14 = vpop.eup %1435  ;;  %1441 = vpow2.f32 %v877_v37  ;;  %v785_v13 = vsub.f32 0.0, %v1434_v6 }
 0x306   : > { %v1438_v59 = vpop.eup %1437  ;;  %1443 = vpow2.f32 %v879_v2  ;;  %v835_v52 = vmul.f32 %v803_v8, %v780_v18  ;;  %v836_v33 = vmul.f32 %v804_v15, %v780_v18  ;;  %v786_v55 = vsub.f32 0.0, %v1436_v14 }
 0x307   : > { %v1440_v26 = vpop.eup %1439  ;;  %v845_v54 = vmul.f32 %v813_v43, %v785_v13  ;;  %v846_v58 = vmul.f32 %v814_v21, %v785_v13  ;;  %v787_v48 = vsub.f32 0.0, %v1438_v59  ;;  %930 = vadd.xlane.f32.xlu0 %v929_v10 }
 0x308   : > { %v881_v50 = vmul.f32 1.442695, %v835_v52  ;;  %v883_v35 = vmul.f32 1.442695, %v836_v33  ;;  %v847_v53 = vmul.f32 %v815_v23, %v786_v55  ;;  %v848_v25 = vmul.f32 %v816_v19, %v786_v55  ;;  %933 = vadd.xlane.f32.xlu1 %v932_v38 }
 0x309   : > { %v901_v27 = vmul.f32 1.442695, %v845_v54  ;;  %v903_v28 = vmul.f32 1.442695, %v846_v58  ;;  %v849_v17 = vmul.f32 %v817_v42, %v787_v48  ;;  %v850_v41 = vmul.f32 %v818_v20, %v787_v48 }
 0x30a   : > { %1445 = vpow2.f32 %v881_v50  ;;  %v905_v56 = vmul.f32 1.442695, %v847_v53  ;;  %v788_v44 = vsub.f32 0.0, %v1440_v26  ;;  %v907_v30 = vmul.f32 1.442695, %v848_v25 }
 0x30b   : > { %1447 = vpow2.f32 %v883_v35  ;;  %v909_v57 = vmul.f32 1.442695, %v849_v17  ;;  %v911_v5 = vmul.f32 1.442695, %v850_v41 }
 0x30c   : > { %1449 = vpow2.f32 %v901_v27  ;;  %v851_v11 = vmul.f32 %v819_v47, %v788_v44  ;;  %v852_v39 = vmul.f32 %v820_v63, %v788_v44 }
 0x30d   : > { %1451 = vpow2.f32 %v903_v28 }
 0x30e   : > { %1453 = vpow2.f32 %v905_v56  ;;  %v913_v7 = vmul.f32 1.442695, %v851_v11  ;;  %v915_v21 = vmul.f32 1.442695, %v852_v39 }
 0x30f   : > { %v2090_v43 = vpop.eup %1441  ;;  %1455 = vpow2.f32 %v907_v30 }
 0x310   : > { %v2092_v23 = vpop.eup %1443  ;;  %1457 = vpow2.f32 %v909_v57 }
 0x311   : > { %1459 = vpow2.f32 %v911_v5  ;;  %v935_v31 = vadd.f32 %v2092_v23, %v2090_v43 }
 0x312   : > { %1461 = vpow2.f32 %v913_v7 }
 0x313   : > { %1463 = vpow2.f32 %v915_v21  ;;  %936 = vadd.xlane.f32.xlu0 %v935_v31 }
 0x314   : > { %v2096_v1 = vpop.eup %1445 }
 0x315   : > { %v2098_v19 = vpop.eup %1447 }
 0x316   : > { %v2100_v37 = vpop.eup %1449  ;;  %v938_v2 = vadd.f32 %v2098_v19, %v2096_v1 }
 0x317   : > { %v2104_v10 = vpop.eup %1451 }
 0x318   : > { %v2106_v6 = vpop.eup %1453  ;;  %939 = vadd.xlane.f32.xlu1 %v938_v2  ;;  %v953_v8 = vadd.f32 %v2104_v10, %v2100_v37 }
 0x319   : > { %v2110_v15 = vpop.eup %1455 }
 0x31a   : > { %v2112_v18 = vpop.eup %1457  ;;  %954 = vadd.xlane.f32.xlu0 %v953_v8  ;;  %v956_v38 = vadd.f32 %v2110_v15, %v2106_v6 }
 0x31b   : > { %v2116_v14 = vpop.eup %1459 }
 0x31c   : > { %v2118_v42 = vpop.eup %1461  ;;  %957 = vadd.xlane.f32.xlu1 %v956_v38  ;;  %v959_v20 = vadd.f32 %v2116_v14, %v2112_v18 }
 0x31d   : > { %v2122_v13 = vpop.eup %1463 }
 0x31e   : > { %960 = vadd.xlane.f32.xlu0 %v959_v20  ;;  %v962_v59 = vadd.f32 %v2122_v13, %v2118_v42 }
 0x320   : > { %963 = vadd.xlane.f32.xlu1 %v962_v59 }
 0x384   : > { %v919_v52 = vpop.xlane.xlu0 %918 }
 0x385   : > { %v922_v33 = vpop.xlane.xlu1 %921 }
 0x388   : > { %v943_v55 = vpop.xlane.xlu0 %942 }
 0x389   : > { %v946_v26 = vpop.xlane.xlu1 %945 }
 0x38c   : > { %v925_v47 = vpop.xlane.xlu0 %924 }
 0x38d   : > { %v928_v54 = vpop.xlane.xlu1 %927  ;;  %1465 = vrcp.f32 %v925_v47 }
 0x38e   : > { %1467 = vrcp.f32 %v919_v52 }
 0x390   : > { %v949_v58 = vpop.xlane.xlu0 %948 }
 0x391   : > { %v952_v48 = vpop.xlane.xlu1 %951 }
 0x394   : > { %v931_v50 = vpop.xlane.xlu0 %930 }
 0x395   : > { %1469 = vrcp.f32 %v931_v50  ;;  %v934_v35 = vpop.xlane.xlu1 %933 }
 0x396   : > { %1471 = vrcp.f32 %v922_v33 }
 0x397   : > { %1473 = vrcp.f32 %v928_v54  ;;  %v1466_v25 = vpop.eup %1465 }
 0x398   : > { %1475 = vrcp.f32 %v943_v55  ;;  %v1468_v27 = vpop.eup %1467  ;;  %v985_v17 = vmul.f32 %v1466_v25, %v2036_v29  ;;  %v986_v63 = vmul.f32 %v1466_v25, %v2040_v32 }
 0x399   : > { %1477 = vrcp.f32 %v934_v35  ;;  %v981_v44 = vmul.f32 %v1468_v27, %v2008_v24  ;;  %v982_v39 = vmul.f32 %v1468_v27, %v2010_v3 }
 0x39b   : > { %v1013_v21 = vmax.f32 %v981_v44, %v985_v17  ;;  %v1034_v2 = vmax.f32 %v982_v39, %v986_v63 }
 0x39f   : > { %v1470_v28 = vpop.eup %1469 }
 0x3a0   : > { %v937_v53 = vpop.xlane.xlu0 %936  ;;  %v1472_v56 = vpop.eup %1471  ;;  %v989_v30 = vmul.f32 %v1470_v28, %v2062_v51  ;;  %v990_v5 = vmul.f32 %v1470_v28, %v2068_v12 }
 0x3a1   : > { %1479 = vrcp.f32 %v937_v53  ;;  %v1474_v11 = vpop.eup %1473  ;;  %v983_v8 = vmul.f32 %v1472_v56, %v2016_v45  ;;  %v984_v52 = vmul.f32 %v1472_v56, %v2018_v22 }
 0x3a2   : > { %1481 = vrcp.f32 %v946_v26  ;;  %v1476_v7 = vpop.eup %1475  ;;  %v987_v24 = vmul.f32 %v1474_v11, %v2044_v34  ;;  %v988_v51 = vmul.f32 %v1474_v11, %v2048_v62  ;;  %v1015_v38 = vmax.f32 %v1013_v21, %v989_v30 }
 0x3a3   : > { %1483 = vrcp.f32 %v949_v58  ;;  %v1478_v31 = vpop.eup %1477  ;;  %v1036_v3 = vmax.f32 %v1034_v2, %v990_v5  ;;  %v997_v33 = vmul.f32 %v1476_v7, %v2024_v49  ;;  %v998_v62 = vmul.f32 %v1476_v7, %v2028_v9 }
 0x3a4   : > { %v991_v55 = vmul.f32 %v1478_v31, %v2072_v60  ;;  %v992_v45 = vmul.f32 %v1478_v31, %v2074_v4 }
 0x3a5   : > { %v940_v41 = vpop.xlane.xlu1 %939 }
 0x3a6   : > { %1485 = vrcp.f32 %v940_v41 }
 0x3a7   : > { %v955_v57 = vpop.xlane.xlu0 %954  ;;  %1487 = vrcp.f32 %v952_v48  ;;  %v1035_v48 = vmax.f32 %v984_v52, %v988_v51 }
 0x3a8   : > { %1489 = vrcp.f32 %v955_v57 }
 0x3a9   : > { %v958_v29 = vpop.xlane.xlu1 %957  ;;  %v1037_v53 = vmax.f32 %v1035_v48, %v992_v45 }
 0x3aa   : > { %1491 = vrcp.f32 %v958_v29 }
 0x3ab   : > { %v1480_v32 = vpop.eup %1479  ;;  %v961_v20 = vpop.xlane.xlu0 %960 }
 0x3ac   : > { %v993_v59 = vmul.f32 %v1480_v32, %v2090_v43  ;;  %v994_v12 = vmul.f32 %v1480_v32, %v2092_v23  ;;  %1493 = vrcp.f32 %v961_v20  ;;  %v1482_v34 = vpop.eup %1481  ;;  %v1014_v43 = vmax.f32 %v983_v8, %v987_v24 }
 0x3ad   : > { %v964_v26 = vpop.xlane.xlu1 %963  ;;  %v1484_v58 = vpop.eup %1483  ;;  %v999_v28 = vmul.f32 %v1482_v34, %v2030_v46  ;;  %v1000_v17 = vmul.f32 %v1482_v34, %v2032_v16  ;;  %v1596_v34 = vmov (!%p1224_p0), 1966171168  }
 0x3ae   : > { %v1017_v47 = vmax.f32 %v1015_v38, %v993_v59  ;;  %v1038_v54 = vmax.f32 %v1036_v3, %v994_v12  ;;  %1495 = vrcp.f32 %v964_v26  ;;  %v1016_v22 = vmax.f32 %v1014_v43, %v991_v55 }
 0x3af   : > { %v1001_v25 = vmul.f32 %v1484_v58, %v2050_v0  ;;  %v1002_v9 = vmul.f32 %v1484_v58, %v2052_v36 }
 0x3b0   : > { %v1486_v23 = vpop.eup %1485  ;;  %v1019_v50 = vmax.f32 %v1017_v47, %v997_v33  ;;  %v1040_v35 = vmax.f32 %v1038_v54, %v998_v62  ;;  %v1062_v62 = vunpack.c.l.s4 (!%p1224_p0), %v1596_v34 }
 0x3b1   : > { %v995_v49 = vmul.f32 %v1486_v23, %v2096_v1  ;;  %v996_v60 = vmul.f32 %v1486_v23, %v2098_v19  ;;  %v1488_v4 = vpop.eup %1487 }
 0x3b2   : > { %v1490_v27 = vpop.eup %1489  ;;  %v1021_v44 = vmax.f32 %v1019_v50, %v1001_v25  ;;  %v1042_v30 = vmax.f32 %v1040_v35, %v1002_v9  ;;  %v1003_v57 = vmul.f32 %v1488_v4, %v2056_v40  ;;  %v1004_v1 = vmul.f32 %v1488_v4, %v2060_v61 }
 0x3b3   : > { %v1018_v41 = vmax.f32 %v1016_v22, %v995_v49  ;;  %v1039_v63 = vmax.f32 %v1037_v53, %v996_v60  ;;  %v1005_v0 = vmul.f32 %v1490_v27, %v2100_v37  ;;  %v1006_v36 = vmul.f32 %v1490_v27, %v2104_v10 }
 0x3b4   : > { %v1492_v56 = vpop.eup %1491  ;;  %v1063_v58 = vunpack.c.0.s8 (!%p1224_p0), %v1062_v62 }
 0x3b5   : > { %v1020_v19 = vmax.f32 %v1018_v41, %v999_v28  ;;  %v1041_v11 = vmax.f32 %v1039_v63, %v1000_v17  ;;  %v1007_v16 = vmul.f32 %v1492_v56, %v2106_v6  ;;  %v1008_v7 = vmul.f32 %v1492_v56, %v2110_v15 }
 0x3b6   : > { %v1494_v39 = vpop.eup %1493  ;;  %v1023_v29 = vmax.f32 %v1021_v44, %v1005_v0  ;;  %v1044_v31 = vmax.f32 %v1042_v30, %v1006_v36 }
 0x3b7   : > { %v1022_v5 = vmax.f32 %v1020_v19, %v1003_v57  ;;  %v1043_v46 = vmax.f32 %v1041_v11, %v1004_v1  ;;  %v1009_v40 = vmul.f32 %v1494_v39, %v2112_v18  ;;  %v1010_v61 = vmul.f32 %v1494_v39, %v2116_v14 }
 0x3b8   : > { %v1496_v21 = vpop.eup %1495 }
 0x3b9   : > { %v1024_v2 = vmax.f32 %v1022_v5, %v1007_v16  ;;  %v1045_v32 = vmax.f32 %v1043_v46, %v1008_v7  ;;  %v1011_v8 = vmul.f32 %v1496_v21, %v2118_v42  ;;  %v1012_v37 = vmul.f32 %v1496_v21, %v2122_v13 }
 0x3ba   : > { %v1025_v10 = vmax.f32 %v1023_v29, %v1009_v40  ;;  %v1046_v24 = vmax.f32 %v1044_v31, %v1010_v61  ;;  %v1064_v13 = vlaneseq (!%p1224_p0) }
 0x3bb   : > { %v1026_v51 = vmax.f32 %v1024_v2, %v1011_v8  ;;  %v1047_v38 = vmax.f32 %v1045_v32, %v1012_v37 }
 0x3bc   : > { %v1065_v47 = vshrl.u32 (!%p1224_p0), %v1064_v13, 7  ;;  %vm1078_vm3 = vcmp.lt.s32.totalorder (!%p1224_p0), %v1064_v13, 256 }
 0x3bd   : > { %v1027_v6 = vmax.f32 %v1025_v10, %v1026_v51  ;;  %v1048_v20 = vmax.f32 %v1046_v24, %v1047_v38 }
 0x3be   : > { %v1066_v43 = vsub.s32 (!%p1224_p0), %v1063_v58, %v1065_v47 }
 0x3bf   : > { %v1028_v15 = vrot.slane %v1027_v6, 4  ;;  %v1049_v3 = vrot.slane %v1048_v20, 4 }
 0x3c1   : > { %v1029_v59 = vmax.f32 %v1027_v6, %v1028_v15  ;;  %v1050_v12 = vmax.f32 %v1048_v20, %v1049_v3 }
 0x3c3   : > { %v1030_v52 = vrot.slane %v1029_v59, 2  ;;  %v1051_v18 = vrot.slane %v1050_v12, 2  ;;  %1057 = sbr.rel (%p1224_p0) target bundleno = 978 (0x3d2), region = 44 }
 0x3c5   : > { %v1031_v33 = vmax.f32 %v1029_v59, %v1030_v52  ;;  %v1052_v14 = vmax.f32 %v1050_v12, %v1051_v18 }
 0x3c7   : > { %v1032_v55 = vrot.slane %v1031_v33, 1  ;;  %v1053_v45 = vrot.slane %v1052_v14, 1 }
 0x3c9   : > { %v1033_v26 = vmax.f32 %v1031_v33, %v1032_v55  ;;  %v1054_v42 = vmax.f32 %v1052_v14, %v1053_v45 }
 0x3cb   : > { %v1060_v54 = vcombine.low %v1033_v26, %v1054_v42 }
 0x3cd   : > { %v1067_v48 = vrot.slane %v1060_v54, %v1066_v43 }
 0x3cf   : > { %v1074_v23 = vrot.slane %v1067_v48, %v1066_v43 }
 0x3d1   : > { %1080 = vst.msk [vmem:[%s1707_s25] sm:$0x3] %vm1078_vm3, %v1074_v23 }
 0x3d2 PF: > { %p1245_p1 = scmp.le.s32.totalorder %s1575_s18, 0 }
 0x3d3   : > { %v1092_v50 = vlaneseq (!%p1245_p1)  ;;  %v1597_v35 = vmov (!%p1245_p1), 1966171168   ;;  %v1088_v49 = vcombine.low (!%p1245_p1), %v1033_v26, %v1054_v42 }
 0x3d4   : > { %1084 = sbr.rel (%p1245_p1) target bundleno = 993 (0x3e1), region = 48  ;;  %v1090_v22 = vunpack.c.l.s4 (!%p1245_p1), %v1597_v35 }
 0x3d5   : > { %v1093_v53 = vshrl.u32 (!%p1245_p1), %v1092_v50, 7  ;;  %vm1107_vm4 = vcmp.lt.s32.totalorder (!%p1245_p1), %v1092_v50, 256 }
 0x3d6   : > { %v1091_v60 = vunpack.c.0.s8 (!%p1245_p1), %v1090_v22 }
 0x3d8   : > { %v1094_v4 = vsub.s32 (!%p1245_p1), %v1091_v60, %v1093_v53  ;;  %v1085_v9 = vld [vmem:[%s1707_s25] sm:$0x3] (!%p1245_p1) }
 0x3da   : > { %v1095_v25 = vrot.slane (!%p1245_p1), %v1088_v49, %v1094_v4 }
 0x3dc   : > { %v1102_v27 = vrot.slane %v1095_v25, %v1094_v4 }
 0x3de   : > { %v1104_v28 = vmax.f32 %v1085_v9, %v1102_v27 }
 0x3e0   : > { %1109 = vst.msk [vmem:[%s1707_s25] sm:$0x3] %vm1107_vm4, %v1104_v28 }
 0x3e1 PF: > { %s1252_s18 = sshll.u32 %s1579_s19, 5  ;;  %s1125_s11 = sshll.u32 %s1707_s25, 4  ;;  %s1126_s11 = int_to_ptr.vmem [resolvable:$true] %s1125_s11 }
 0x3e2   : > { %s2168_s10 = scalar_lea.hbm %s2222_s4, %s1252_s18  ;;  %s2229_s12 = sand.u32 1, %s1567_s16  }
 0x3e3   : > { %s1111_s13 = scalar_lea.sflag [#allocation4], %s2229_s12  ;;  %s1497_s14 = scalar_lea.vmem %s1126_s11, 32 }
 0x3e4   : > { %p1498_p2 = scmp.ne.s32.totalorder %s1126_s11, %s1497_s14  ;;  %s1598_s23 = smov [#allocation3]  }
 0x3e5   : > { %s1501_s24 = sshll.u32 %s1598_s23, 4  ;;  %s1502_s24 = int_to_ptr.vmem [resolvable:$false] %s1501_s24 }
 0x3e6   : > { %p1499_p4 = pnand %p1498_p2, %p1673_p3  ;;  %s1503_s29 = scalar_lea.vmem %s1502_s24, 64 }
 0x3e7   : > { %p1504_p6 = scmp.lt.s32.totalorder %s1126_s11, %s1502_s24  ;;  %p1505_p7 = scmp.lt.s32.totalorder %s1503_s29, %s1497_s14 }
 0x3e8   : > { %p1500_p5 = pneg %p1499_p4 }
 0x3e9   : > { %p1506_p8 = por %p1505_p7, %p1504_p6 }
 0x3eb   : > { %p1507_p10 = pnand %p1506_p8, %p1500_p5 }
 0x3ed   : > { %1510 = shalt.err (!%p1507_p10)
}
 0x3ee   : > { %s1511_s19 = scalar_lea.hbm %s2168_s10, 32  ;;  %s1515_s9 = scalar_lea.hbm %s2222_s4, 64 }
 0x3ef   : > { %p1512_p11 = scmp.ne.s32.totalorder %s2168_s10, %s1511_s19  ;;  %p1516_p0 = scmp.lt.u32.totalorder %s2168_s10, %s2222_s4 }
 0x3f0   : > { %p1517_p1 = scmp.lt.u32.totalorder %s1515_s9, %s1511_s19  ;;  %p1519_p4 = scmp.lt.u32.totalorder %s1511_s19, %s2168_s10 }
 0x3f1   : > { %p1513_p12 = pnand %p1512_p11, %p1673_p3 }
 0x3f2   : > { %p1518_p2 = por %p1517_p1, %p1516_p0 }
 0x3f3   : > { %p1514_p13 = pneg %p1513_p12 }
 0x3f4   : > { %p1520_p5 = por %p1519_p4, %p1518_p2 }
 0x3f6   : > { %p1521_p6 = pnand %p1520_p5, %p1514_p13 }
 0x3f8   : > { %1524 = shalt.err (!%p1521_p6)
}
 0x3f9   : > { %1255 = dma.vmem_to_hbm [thread:$0]  (%p1673_p3), %s1126_s11, 32, %s2168_s10, %s1111_s13  }
 0x3fa PF: > { %p1261_p7 = scmp.ge.s32.totalorder %s1591_s22, 2  ;;  %s1137_s18 = sand.u32 1, %s1563_s15  }
 0x3fb   : > { %s1138_s26 = scalar_lea.sflag [#allocation4], %s1137_s18 }
 0x3fc   : > { %p1258_p8 = pnand %p1261_p7, %p1683_p9 }
 0x3fe   : > { %1558 = dma.done.wait (!%p1258_p8), %s1138_s26, 32  }
 0x3ff   : > { %1560 = vsyncadd (!%p1258_p8), %s1138_s26, 4294967264  ;;  %s17_s22 = sadd.s32 1, %s1591_s22   ;;  %s2230_s27 = sld [smem:[#allocation6_spill]] }
 0x400   : > { %p14_p10 = scmp.ge.s32.totalorder %s17_s22, 6   ;;  %s2231_s8 = sld [smem:[#allocation7_spill]] }
 0x401   : > { %s2232_s15 = smov %s1567_s16  ;;  %s2233_s16 = smov %s1571_s17 }
 0x402   : > { %s2234_s17 = smov %s1691_s5  ;;  %s2235_s18 = smov %s1583_s20 }
 0x403   : > { %s2236_s19 = smov %s1587_s21  ;;  %16 = sbr.rel (!%p14_p10) target bundleno = 5 (0x5), region = 86 }
 0x405   : > { %s2237_s20 = smov %s2230_s27 }
 0x406   : > { %s2238_s21 = smov %s2231_s8 }
 0x40a   :  { %1143 = vsyncpa [#allocation4], 1 }
 0x40b   :  { %1145 = vsyncpa [#allocation4 + $0x1], 1 }

</bundles_post_ra>
